<compile_context>
chip_gen: v6e
topology: v6e:2x2x1
jax: 0.10.0
libtpu: 0.0.40
codegen_flags: <defaults>
</compile_context>

<pallas_src>
import jax
import jax.numpy as jnp
from jax import lax
from jax.experimental import pallas as pl
from jax.experimental.pallas import tpu as pltpu


def _round_up(x: int, m: int) -> int:
    return ((x + m - 1) // m) * m


def _make_loss_kernel(loss_type, tile_m, lane, rows, tiles_per_split, num_splits):
    folds = tile_m >= 8 and tile_m % 8 == 0
    full_tiles = rows // tile_m            # tiles with no out-of-bounds rows
    total_steps = num_splits * tiles_per_split

    def kernel(x1_ref, x2_ref, out_ref, acc_ref):
        p = pl.program_id(0)
        r = pl.program_id(1)

        # Fresh accumulator at the start of each split's reduction.
        @pl.when(r == 0)
        def _init():
            acc_ref[...] = jnp.zeros_like(acc_ref)

        # Inputs arrive in their storage dtype; cast to f32 on the VPU.
        a = x1_ref[...].astype(jnp.float32)
        b = x2_ref[...].astype(jnp.float32)

        if loss_type == "l2":
            d = (a - b) * (a - b)
        elif loss_type == "l1":
            d = jnp.abs(a - b)
        else:  # 'bce' — matches torch.nn.functional.binary_cross_entropy
            # torch clamps the log terms at -100 for numerical stability.
            log_a = jnp.maximum(jnp.log(a), -100.0)
            log_1ma = jnp.maximum(jnp.log(1.0 - a), -100.0)
            d = -(b * log_a + (1.0 - b) * log_1ma)

        def accumulate(vals):
            if folds:
                # Pure-VPU sublane-group fold: (tile_m, lane) -> (8, lane).
                acc_ref[...] += jnp.sum(vals.reshape(tile_m // 8, 8, lane), axis=0)
            else:
                # Tiny-input path (rows < 8): single-row accumulate.
                acc_ref[0:1, :] += jnp.sum(vals, axis=0, keepdims=True)

        logical_tile = p * tiles_per_split + r

        if full_tiles >= total_steps:
            # The grid tiles `rows` exactly; no masking anywhere.
            accumulate(d)
        else:
            if full_tiles > 0:
                @pl.when(logical_tile < full_tiles)
                def _full():
                    accumulate(d)

            @pl.when(logical_tile >= full_tiles)
            def _tail():
                # Rows past `rows` hold garbage (or a re-read of the last tile
                # for clamped fully-out-of-range steps): select them to 0.
                # jnp.where is a select, so NaN/inf from garbage never leaks.
                row_ids = logical_tile * tile_m + lax.broadcasted_iota(
                    jnp.int32, (tile_m, lane), 0)
                accumulate(jnp.where(row_ids < rows, d, 0.0))

        # Last reduction step: fold lanes down to one (8, 128) block per split
        # (written back to HBM exactly once per split).
        @pl.when(r == tiles_per_split - 1)
        def _finalize():
            acc = acc_ref[...]
            out_ref[...] = jnp.sum(acc.reshape(8, lane // 128, 128), axis=1)

    return kernel


def pianoroll_distance_loss(x1, x2, loss_type="l2", *, num_splits=2,
                            max_block_elems=512 * 1024):
    """Pallas TPU implementation of PianorollDistanceLoss.forward.

    x1, x2: same shape; the leading dim is the batch. Returns a scalar f32 loss
    (= sum-reduced distance / batch_size). Inputs may be any float dtype
    (f32 / bf16 / ...); they are cast to f32 inside the kernel.
    """
    assert loss_type in ("l2", "l1", "bce"), f"{loss_type} is not supported."
    assert x1.shape == x2.shape
    batch_size = x1.shape[0]

    total = 1
    for s in x1.shape:
        total *= int(s)

    # Lane width: the largest 128-multiple dividing the flattened size,
    # preferring one that leaves >= 8 rows.  When it divides exactly the
    # reshape below is a free view — no pad, no copy.
    lane = 0
    for cand in (512, 256, 128):
        if total % cand == 0 and total // cand >= 8:
            lane = cand
            break
    if lane == 0:
        for cand in (512, 256, 128):
            if total % cand == 0:
                lane = cand
                break

    x1f = x1.reshape(-1)
    x2f = x2.reshape(-1)

    if lane == 0:
        # Rare fallback: flattened size not a multiple of 128.  Pad minimally
        # (to one 128-lane row); pad values contribute exactly 0 to every loss
        # variant (l1/l2: 0; bce: a=b=1 together with the -100 log clamp).
        # This is the only path that copies the inputs.
        lane = 128
        padded = _round_up(total, lane)
        pad_val = 1.0 if loss_type == "bce" else 0.0
        x1f = jnp.pad(x1f, (0, padded - total), constant_values=pad_val)
        x2f = jnp.pad(x2f, (0, padded - total), constant_values=pad_val)
        eff_total = padded
    else:
        eff_total = total

    rows = eff_total // lane
    x1f = x1f.reshape(rows, lane)
    x2f = x2f.reshape(rows, lane)

    # Row tile: as big as allowed (amortizes per-step overhead) but never more
    # than rows rounded up to 8-sublane granularity; ragged tails are masked
    # in-kernel instead of padded in HBM.
    if rows >= 8:
        tile_m = min(max_block_elems // lane, _round_up(rows, 8))
        tile_m = max(8, (tile_m // 8) * 8)
    else:
        tile_m = rows  # full-dim block (legal) for tiny inputs

    num_r_tiles = pl.cdiv(rows, tile_m)
    num_splits = max(1, min(num_splits, num_r_tiles))
    tiles_per_split = pl.cdiv(num_r_tiles, num_splits)
    last_tile = num_r_tiles - 1

    def in_index_map(p, r):
        # Clamp so a split never DMAs a fully out-of-range tile (such steps
        # re-read the last tile and are zeroed by the in-kernel row mask).
        return (jnp.minimum(p * tiles_per_split + r, last_tile), 0)

    kernel = _make_loss_kernel(loss_type, tile_m, lane, rows,
                               tiles_per_split, num_splits)

    partials = pl.pallas_call(
        kernel,
        out_shape=jax.ShapeDtypeStruct((num_splits * 8, 128), jnp.float32),
        grid_spec=pltpu.PrefetchScalarGridSpec(
            num_scalar_prefetch=0,
            grid=(num_splits, tiles_per_split),
            in_specs=[
                pl.BlockSpec((tile_m, lane), in_index_map),
                pl.BlockSpec((tile_m, lane), in_index_map),
            ],
            out_specs=pl.BlockSpec((8, 128), lambda p, r: (p, 0)),
            scratch_shapes=[pltpu.VMEM((8, lane), jnp.float32)],
        ),
        compiler_params=pltpu.CompilerParams(
            # Split axis maps onto v7x's two TensorCores; reduction axis last.
            dimension_semantics=("parallel", "arbitrary"),
            vmem_limit_bytes=48 * 1024 * 1024,
        ),
    )(x1f, x2f)

    # Tiny final reduce of <= num_splits*8*128 partials + batch mean.
    return jnp.sum(partials) / batch_size


def _reference(x1, x2, loss_type):
    b = x1.shape[0]
    a = x1.astype(jnp.float32)
    t = x2.astype(jnp.float32)
    if loss_type == "l2":
        d = jnp.sum((a - t) ** 2)
    elif loss_type == "l1":
        d = jnp.sum(jnp.abs(a - t))
    else:
        log_a = jnp.maximum(jnp.log(a), -100.0)
        log_1ma = jnp.maximum(jnp.log(1.0 - a), -100.0)
        d = jnp.sum(-(t * log_a + (1.0 - t) * log_1ma))
    return d / b


if __name__ == "__main__":
    key = jax.random.PRNGKey(0)

    # Small configs exercising: exact tiling, in-kernel ragged-row masking,
    # the 2-way parallel split with a clamped fully-out-of-range tile, and the
    # rare pad fallback.
    configs = [
        ((2, 4, 16, 16), {}),                            # exact, single tile
        ((2, 5, 24, 16), {"max_block_elems": 2048}),     # 2 splits, partial last tile
        ((2, 4, 34, 16), {"max_block_elems": 2048}),     # odd tile count -> clamped step
        ((2, 3, 5, 7), {}),                              # ragged fallback (pad to 128)
    ]

    ok = True
    for shape, kwargs in configs:
        key, k1, k2 = jax.random.split(key, 3)
        # Values in (0, 1) so that 'bce' is valid too.
        x1 = jax.nn.sigmoid(jax.random.normal(k1, shape, dtype=jnp.float32))
        x2 = jax.random.uniform(k2, shape, dtype=jnp.float32)
        for lt in ("l2", "l1", "bce"):
            got = jax.block_until_ready(
                pianoroll_distance_loss(x1, x2, loss_type=lt, **kwargs))
            ref = jax.block_until_ready(_reference(x1, x2, lt))
            if not jnp.allclose(got, ref, rtol=1e-4, atol=1e-3):
                ok = False
                print(f"MISMATCH[{lt} {shape} {kwargs}]: kernel={got} ref={ref}")

    if ok:
        print("KERNEL_OK")
</pallas_src>

<mosaic_0001>
module attributes {stable_mosaic.version = 11 : i64} {
  func.func @kernel(%arg0: i32, %arg1: i32, %arg2: memref<8x256xf32, #tpu.memory_space<vmem>>, %arg3: memref<8x256xf32, #tpu.memory_space<vmem>>, %arg4: memref<8x128xf32, #tpu.memory_space<vmem>>, %arg5: memref<8x256xf32, #tpu.memory_space<vmem>>) attributes {dimension_semantics = [#tpu.dimension_semantics<parallel>, #tpu.dimension_semantics<arbitrary>], iteration_bounds = array<i64: 1, 1>, scalar_prefetch = 0 : i64, scratch_operands = 1 : i64, tpu.core_type = #tpu.core_type<tc>, window_params = [{transform_indices = @transform_0, window_bounds = array<i64: 8, 256>}, {transform_indices = @transform_1, window_bounds = array<i64: 8, 256>}, {transform_indices = @transform_2, window_bounds = array<i64: 8, 128>}]} {
    %c0_i32 = arith.constant 0 : i32
    %0 = arith.cmpi eq, %arg1, %c0_i32 : i32
    %1 = arith.extui %0 : i1 to i32
    %c0_i32_0 = arith.constant 0 : i32
    %2 = arith.cmpi ne, %1, %c0_i32_0 : i32
    scf.if %2 {
      %cst_10 = arith.constant 0.000000e+00 : f32
      %16 = vector.broadcast %cst_10 : f32 to vector<8x256xf32>
      %c0_11 = arith.constant 0 : index
      %c0_12 = arith.constant 0 : index
      %17 = vector.load %arg5[%c0_11, %c0_12] : memref<8x256xf32, #tpu.memory_space<vmem>>, vector<8x256xf32>
      tpu.vector_store %arg5[%c0_11, %c0_12], %16 {strides = array<i32>} : memref<8x256xf32, #tpu.memory_space<vmem>>, vector<8x256xf32>,
    } else {
    }
    %c0 = arith.constant 0 : index
    %c0_1 = arith.constant 0 : index
    %3 = vector.load %arg2[%c0, %c0_1] : memref<8x256xf32, #tpu.memory_space<vmem>>, vector<8x256xf32>
    %c0_2 = arith.constant 0 : index
    %c0_3 = arith.constant 0 : index
    %4 = vector.load %arg3[%c0_2, %c0_3] : memref<8x256xf32, #tpu.memory_space<vmem>>, vector<8x256xf32>
    %5 = arith.subf %3, %4 : vector<8x256xf32>
    %6 = arith.subf %3, %4 : vector<8x256xf32>
    %7 = arith.mulf %5, %6 : vector<8x256xf32>
    %c0_4 = arith.constant 0 : index
    %c0_5 = arith.constant 0 : index
    %8 = vector.load %arg5[%c0_4, %c0_5] : memref<8x256xf32, #tpu.memory_space<vmem>>, vector<8x256xf32>
    %9 = vector.shape_cast %7 : vector<8x256xf32> to vector<1x8x256xf32>
    %cst = arith.constant dense<0.000000e+00> : vector<8x256xf32>
    %10 = vector.multi_reduction <add>, %9, %cst [0] : vector<1x8x256xf32> to vector<8x256xf32>
    %11 = arith.addf %8, %10 : vector<8x256xf32>
    %c0_6 = arith.constant 0 : index
    %c0_7 = arith.constant 0 : index
    %12 = vector.load %arg5[%c0_6, %c0_7] : memref<8x256xf32, #tpu.memory_space<vmem>>, vector<8x256xf32>
    tpu.vector_store %arg5[%c0_6, %c0_7], %11 {strides = array<i32>} : memref<8x256xf32, #tpu.memory_space<vmem>>, vector<8x256xf32>,
    %c0_i32_8 = arith.constant 0 : i32
    %13 = arith.cmpi eq, %arg1, %c0_i32_8 : i32
    %14 = arith.extui %13 : i1 to i32
    %c0_i32_9 = arith.constant 0 : i32
    %15 = arith.cmpi ne, %14, %c0_i32_9 : i32
    scf.if %15 {
      %c0_10 = arith.constant 0 : index
      %c0_11 = arith.constant 0 : index
      %16 = vector.load %arg5[%c0_10, %c0_11] : memref<8x256xf32, #tpu.memory_space<vmem>>, vector<8x256xf32>
      %17 = vector.shape_cast %16 : vector<8x256xf32> to vector<8x2x128xf32>
      %cst_12 = arith.constant dense<0.000000e+00> : vector<8x128xf32>
      %18 = vector.multi_reduction <add>, %17, %cst_12 [1] : vector<8x2x128xf32> to vector<8x128xf32>
      %c0_13 = arith.constant 0 : index
      %c0_14 = arith.constant 0 : index
      %19 = vector.load %arg4[%c0_13, %c0_14] : memref<8x128xf32, #tpu.memory_space<vmem>>, vector<8x128xf32>
      tpu.vector_store %arg4[%c0_13, %c0_14], %18 {strides = array<i32>} : memref<8x128xf32, #tpu.memory_space<vmem>>, vector<8x128xf32>,
    } else {
    }
    return
  }
  func.func @transform_0(%arg0: i32, %arg1: i32) -> (i32, i32) {
    %c1_i32 = arith.constant 1 : i32
    %0 = arith.muli %arg0, %c1_i32 : i32
    %1 = arith.addi %0, %arg1 : i32
    %c0_i32 = arith.constant 0 : i32
    %2 = arith.minsi %1, %c0_i32 : i32
    %c0_i32_0 = arith.constant 0 : i32
    %c0_i32_1 = arith.constant 0 : i32
    return %2, %c0_i32_0 : i32, i32
  }
  func.func @transform_1(%arg0: i32, %arg1: i32) -> (i32, i32) {
    %c1_i32 = arith.constant 1 : i32
    %0 = arith.muli %arg0, %c1_i32 : i32
    %1 = arith.addi %0, %arg1 : i32
    %c0_i32 = arith.constant 0 : i32
    %2 = arith.minsi %1, %c0_i32 : i32
    %c0_i32_0 = arith.constant 0 : i32
    %c0_i32_1 = arith.constant 0 : i32
    return %2, %c0_i32_0 : i32, i32
  }
  func.func @transform_2(%arg0: i32, %arg1: i32) -> (i32, i32) {
    %c0_i32 = arith.constant 0 : i32
    %c0_i32_0 = arith.constant 0 : i32
    return %arg0, %c0_i32 : i32, i32
  }
}

</mosaic_0001>

<bundles_post_ra>
// kernel: tpu_custom_call.1
= control target key start
LH: loop header
LB: loop body
LE: loop exit
PB: predicated region body
PF: predicated region fallthrough
CT: control target
= control target key end

     0   :  { %7 = vsyncpa [#allocation4], 0  ;;  %s360_s0 = inlined_call_operand.hbm [shape: f32[8,256], index: 0, kind: input, shape index: {}]   ;;  %s361_s1 = inlined_call_operand.hbm [shape: f32[8,256], index: 1, kind: input, shape index: {}]   ;;  %s362_s2 = inlined_call_operand.hbm [shape: f32[8,128], index: 2, kind: output, shape index: {}]  }
   0x1   :  { %8 = vsyncpa [#allocation7], 0 }
   0x2   :  { %9 = vsyncpa [#allocation5], 0  ;;  %s320_s9 = smov [#allocation3]   ;;  %s321_s11 = smov [#allocation6]  }
   0x3   :  { %s22_s10 = sshll.u32 %s320_s9, 4  ;;  %s38_s12 = sshll.u32 %s321_s11, 4  ;;  %s23_s10 = int_to_ptr.vmem [resolvable:$true] %s22_s10  ;;  %s39_s12 = int_to_ptr.vmem [resolvable:$true] %s38_s12 }
   0x4   :  { %s262_s13 = scalar_lea.vmem %s23_s10, 256  ;;  %p267_p1 = scmp.lt.s32.totalorder %s23_s10, %s23_s10 }
   0x5   :  { %p263_p0 = scmp.ne.s32.totalorder %s23_s10, %s262_s13  ;;  %p268_p2 = scmp.lt.s32.totalorder %s262_s13, %s262_s13 }
   0x7   :  { %p269_p3 = por %p268_p2, %p267_p1 }
   0x9   :  { %p270_p4 = pnand %p269_p3, %p263_p0 }
   0xb   :  { %273 = shalt.err (!%p270_p4)
}
   0xc   :  { %25 = dma.hbm_to_vmem [thread:$0]  %s360_s0, 256, %s23_s10, [#allocation4]  }
   0xd   :  { %s282_s16 = scalar_lea.vmem %s39_s12, 256  ;;  %p287_p6 = scmp.lt.s32.totalorder %s39_s12, %s39_s12 }
   0xe   :  { %p283_p5 = scmp.ne.s32.totalorder %s39_s12, %s282_s16  ;;  %p288_p7 = scmp.lt.s32.totalorder %s282_s16, %s282_s16 }
  0x10   :  { %p289_p8 = por %p288_p7, %p287_p6 }
  0x12   :  { %p290_p9 = pnand %p289_p8, %p283_p5 }
  0x14   :  { %293 = shalt.err (!%p290_p9)
}
  0x15   :  { %41 = dma.hbm_to_vmem [thread:$0]  %s361_s1, 256, %s39_s12, [#allocation7]  }
  0x16   :  { %314 = dma.done.wait [#allocation4], 256  }
  0x17   :  { %315 = vsyncadd [#allocation4], 4294967040 }
  0x18   :  { %316 = dma.done.wait [#allocation7], 256  }
  0x19   :  { %317 = vsyncadd [#allocation7], 4294967040  ;;  %v85_v0 = vlaneseq  ;;  %v322_v1 = vmov 1983009808   ;;  %v323_v5 = vmov 1934713408  }
  0x1a   :  { %v83_v2 = vunpack.c.l.s4 %v322_v1  ;;  %v114_v6 = vunpack.c.l.s4 %v323_v5  ;;  %v60_v7 = vld [vmem:[#allocation3] sm:$0xff]  ;;  %v61_v8 = vld [vmem:[#allocation3 + $0x8] sm:$0xff]  ;;  %v62_v9 = vld [vmem:[#allocation6] sm:$0xff]  ;;  %v324_v17 = vmov 0.0   ;;  %vm147_vm0 = vcmask 1041408   ;;  %s325_s0 = smov [#allocation8]  }
  0x1b   :  { %v86_v4 = vshrl.u32 %v85_v0, 7  ;;  %v63_v10 = vld [vmem:[#allocation6 + $0x8] sm:$0xff]  ;;  %v64_v11 = vsub.f32 %v60_v7, %v62_v9  ;;  %vm212_vm1 = vcmask 1041409   ;;  %vm214_vm2 = vcmask 1042434   ;;  %s234_s1 = sshll.u32 %s325_s0, 4  ;;  %s235_s1 = int_to_ptr.vmem [resolvable:$true] %s234_s1 }
  0x1c   :  { %v84_v3 = vunpack.c.0.s8 %v83_v2  ;;  %v65_v13 = vsub.f32 %v61_v8, %v63_v10  ;;  %v115_v14 = vunpack.c.0.s8 %v114_v6  ;;  %vm216_vm3 = vcmask 1043459   ;;  %s294_s19 = scalar_lea.vmem %s235_s1, 128  ;;  %p299_p11 = scmp.lt.s32.totalorder %s235_s1, %s235_s1 }
  0x1d   :  { %v66_v15 = vmul.f32 %v64_v11, %v64_v11  ;;  %vm218_vm4 = vcmask 1044484   ;;  %vm220_vm5 = vcmask 1045509   ;;  %vm222_vm6 = vcmask 1046534   ;;  %p295_p10 = scmp.ne.s32.totalorder %s235_s1, %s294_s19  ;;  %p300_p12 = scmp.lt.s32.totalorder %s294_s19, %s294_s19 }
  0x1e   :  { %v87_v12 = vsub.s32 %v84_v3, %v86_v4  ;;  %v67_v16 = vmul.f32 %v65_v13, %v65_v13  ;;  %v118_v22 = vsub.s32 %v115_v14, %v86_v4  ;;  %vm224_vm7 = vcmask 1047559  }
  0x1f   :  { %v81_v18 = vcombine.high %v66_v15, %v324_v17  ;;  %p301_p13 = por %p300_p12, %p299_p11 }
  0x20   :  { %v88_v19 = vrot.slane %v66_v15, %v87_v12  ;;  %v96_v20 = vcombine.high %v67_v16, %v324_v17  ;;  %v103_v21 = vrot.slane %v67_v16, %v87_v12 }
  0x21   :  { %v95_v23 = vrot.slane %v81_v18, %v87_v12  ;;  %p302_p0 = pnand %p301_p13, %p295_p10 }
  0x22   :  { %v110_v24 = vrot.slane %v96_v20, %v87_v12  ;;  %v111_v25 = vcombine.low %v88_v19, %v103_v21  ;;  %v112_v26 = vcombine.high %v88_v19, %v103_v21 }
  0x24   :  { %v119_v27 = vrot.slane %v111_v25, %v118_v22  ;;  %v126_v28 = vrot.slane %v112_v26, %v118_v22  ;;  %v127_v29 = vcombine.low %v95_v23, %v110_v24  ;;  %v128_v30 = vcombine.high %v95_v23, %v110_v24 }
  0x26   :  { %v135_v31 = vrot.slane %v127_v29, %v118_v22  ;;  %v142_v32 = vrot.slane %v128_v30, %v118_v22  ;;  %v143_v33 = vcombine.high %v119_v27, %v324_v17  ;;  %v144_v34 = vcombine.high %v126_v28, %v324_v17 }
  0x27   :  { %v148_v35 = vsel %vm147_vm0, %v119_v27, 0.0  ;;  %v162_v36 = vsel %vm147_vm0, %v126_v28, 0.0 }
  0x28   :  { %v145_v37 = vcombine.high %v135_v31, %v324_v17  ;;  %v146_v38 = vcombine.high %v142_v32, %v324_v17  ;;  %v149_v39 = vrot.slane %v148_v35, 4  ;;  %v155_v40 = vsel %vm147_vm0, %v143_v33, 0.0 }
  0x29   :  { %v156_v41 = vrot.slane %v155_v40, 4  ;;  %v163_v42 = vrot.slane %v162_v36, 4  ;;  %v169_v43 = vsel %vm147_vm0, %v144_v34, 0.0  ;;  %v176_v44 = vsel %vm147_vm0, %v135_v31, 0.0 }
  0x2a   :  { %v150_v45 = vadd.f32 %v149_v39, %v148_v35  ;;  %v170_v46 = vrot.slane %v169_v43, 4  ;;  %v177_v47 = vrot.slane %v176_v44, 4  ;;  %v183_v48 = vsel %vm147_vm0, %v145_v37, 0.0 }
  0x2b   :  { %v157_v49 = vadd.f32 %v156_v41, %v155_v40  ;;  %v164_v50 = vadd.f32 %v163_v42, %v162_v36  ;;  %v184_v51 = vrot.slane %v183_v48, 4  ;;  %v190_v52 = vsel %vm147_vm0, %v142_v32, 0.0 }
  0x2c   :  { %v151_v53 = vrot.slane %v150_v45, 2  ;;  %v171_v54 = vadd.f32 %v170_v46, %v169_v43  ;;  %v178_v55 = vadd.f32 %v177_v47, %v176_v44  ;;  %v191_v56 = vrot.slane %v190_v52, 4 }
  0x2d   :  { %v158_v57 = vrot.slane %v157_v49, 2  ;;  %v165_v58 = vrot.slane %v164_v50, 2  ;;  %v185_v59 = vadd.f32 %v184_v51, %v183_v48  ;;  %v197_v60 = vsel %vm147_vm0, %v146_v38, 0.0 }
  0x2e   :  { %v152_v61 = vadd.f32 %v151_v53, %v150_v45  ;;  %v172_v62 = vrot.slane %v171_v54, 2  ;;  %v179_v63 = vrot.slane %v178_v55, 2  ;;  %v192_v0 = vadd.f32 %v191_v56, %v190_v52 }
  0x2f   :  { %v159_v1 = vadd.f32 %v158_v57, %v157_v49  ;;  %v166_v2 = vadd.f32 %v165_v58, %v164_v50  ;;  %v186_v3 = vrot.slane %v185_v59, 2  ;;  %v198_v4 = vrot.slane %v197_v60, 4 }
  0x30   :  { %v153_v5 = vrot.slane %v152_v61, 1  ;;  %v173_v6 = vadd.f32 %v172_v62, %v171_v54  ;;  %v180_v7 = vadd.f32 %v179_v63, %v178_v55  ;;  %v193_v8 = vrot.slane %v192_v0, 2 }
  0x31   :  { %v160_v9 = vrot.slane %v159_v1, 1  ;;  %v167_v10 = vrot.slane %v166_v2, 1  ;;  %v187_v11 = vadd.f32 %v186_v3, %v185_v59  ;;  %v199_v12 = vadd.f32 %v198_v4, %v197_v60 }
  0x32   :  { %v154_v13 = vadd.f32 %v153_v5, %v152_v61  ;;  %v174_v14 = vrot.slane %v173_v6, 1  ;;  %v181_v15 = vrot.slane %v180_v7, 1  ;;  %v194_v16 = vadd.f32 %v193_v8, %v192_v0 }
  0x33   :  { %v161_v17 = vadd.f32 %v160_v9, %v159_v1  ;;  %v168_v18 = vadd.f32 %v167_v10, %v166_v2  ;;  %v188_v19 = vrot.slane %v187_v11, 1  ;;  %v200_v20 = vrot.slane %v199_v12, 2 }
  0x34   :  { %v175_v21 = vadd.f32 %v174_v14, %v173_v6  ;;  %v182_v22 = vadd.f32 %v181_v15, %v180_v7  ;;  %v195_v23 = vrot.slane %v194_v16, 1 }
  0x35   :  { %v189_v24 = vadd.f32 %v188_v19, %v187_v11  ;;  %v201_v25 = vadd.f32 %v200_v20, %v199_v12  ;;  %v213_v26 = vsel %vm212_vm1, %v161_v17, %v154_v13 }
  0x36   :  { %v196_v27 = vadd.f32 %v195_v23, %v194_v16  ;;  %v215_v28 = vsel %vm214_vm2, %v168_v18, %v213_v26 }
  0x37   :  { %v202_v29 = vrot.slane %v201_v25, 1  ;;  %v217_v30 = vsel %vm216_vm3, %v175_v21, %v215_v28 }
  0x38   :  { %v219_v31 = vsel %vm218_vm4, %v182_v22, %v217_v30 }
  0x39   :  { %v203_v32 = vadd.f32 %v202_v29, %v201_v25  ;;  %v221_v33 = vsel %vm220_vm5, %v189_v24, %v219_v31 }
  0x3a   :  { %v223_v34 = vsel %vm222_vm6, %v196_v27, %v221_v33 }
  0x3b   :  { %v225_v35 = vsel %vm224_vm7, %v203_v32, %v223_v34 }
  0x3c   :  { %227 = vst [vmem:[#allocation8] sm:$0xff] %v225_v35 }
  0x3d   :  { %305 = shalt.err (!%p302_p0)
}
  0x3e   :  { %237 = dma.vmem_to_hbm [thread:$0]  %s235_s1, 128, %s362_s2, [#allocation5]  }
  0x3f   :  { %318 = dma.done.wait [#allocation5], 128  }
  0x40   :  { %319 = vsyncadd [#allocation5], 4294967168 }
  0x41   :  { %241 = vsyncpa [#allocation4], 1 }
  0x42   :  { %242 = vsyncpa [#allocation7], 1 }
  0x43   :  { %243 = vsyncpa [#allocation5], 1 }

</bundles_post_ra>
